<compile_context>
chip_gen: v7x
topology: tpu7x:2x2x1
jax: 0.10.0
libtpu: 0.0.40
codegen_flags: <defaults>
</compile_context>

<pallas_src>
import math
import numpy as np
import jax
import jax.numpy as jnp
from jax.experimental import pallas as pl
from jax.experimental.pallas import tpu as pltpu


def _build_group_to_freq_matrix(length):
    """Replicates the `m` buffer from FFTMask.__init__ (shape (G, F))."""
    F = length // 2 + 1
    G = int(math.log2(length))
    m = np.zeros((G, F), dtype=np.float32)
    splits = 2 ** np.arange(G)
    for i in range(G):
        if i == 0:
            m[i, 0:1] = 1.0
        elif i == 1:
            m[i, 1:3] = 1.0
        else:
            m[i, splits[i] // 2 + 1: splits[i] + 1] = 1.0
    return m


def _dft_matrices(length):
    """Real/imag parts of the DFT matrix W[j,k] = exp(-2*pi*i*j*k/L)."""
    n = np.arange(length)
    theta = 2.0 * np.pi * np.outer(n, n) / length
    return np.cos(theta).astype(np.float32), (-np.sin(theta)).astype(np.float32)


def _pick_channel_block(C, L, B):
    """Largest divisor c_blk of C such that
       * c_blk <= 8 and c_blk*L <= 2048 (the (2*c_blk*L, c_blk*L) bf16 block-diag
         factor is quadratic in c_blk: keeps it small + ~c_blk x FLOP overhead
         modest, and safely inside v7x's 32 MiB scoped-VMEM default),
       * at least 2 total grid steps remain when there is >1 unit of work
         (two TensorCores on v7x-style parts),
       preferring c_blk*L that is a multiple of 256 (v6e/v7x MXU width), then 128."""
    limit = max(1, min(8, 2048 // L))
    cands = [c for c in range(1, min(C, limit) + 1) if C % c == 0]
    if B * C >= 2:
        two_step = [c for c in cands if B * (C // c) >= 2]
        if two_step:
            cands = two_step
    return max(cands, key=lambda c: ((c * L) % 256 == 0, (c * L) % 128 == 0, c))


def _fftmask_kernel(x_ref, bd_ref, ari_ref, o_ref):
    """One batch element x one channel block; everything row-stacked (NCHW row order).

    x_ref:   (1, c_blk*L, L)          input rows, channels stacked along sublanes
    bd_ref:  (1, 2*c_blk*L, c_blk*L)  bf16 [blockdiag_c(Ar); blockdiag_c(Ai)]
    ari_ref: (1, 2*L, L)              bf16 [Ar; Ai]   (Ar^T == Ar, Ai^T == -Ai)
    o_ref:   (1, c_blk*L, L)          output rows, same layout as x
    """
    L = ari_ref.shape[1] // 2
    M = x_ref.shape[1]                               # c_blk * L

    x = x_ref[0].astype(jnp.bfloat16)                # (M, L)  bf16 MXU operand
    bd = bd_ref[0]                                   # (2M, M) bf16

    # u = [blockdiag(Ar) @ X_rows ; blockdiag(Ai) @ X_rows] -- one MXU pass,
    # K = M fills the contraction; no lane movement anywhere in this kernel.
    u = jnp.dot(bd, x, preferred_element_type=jnp.float32).astype(jnp.bfloat16)

    ari = ari_ref[0]                                 # (2L, L)
    ar = ari[:L, :]                                  # Ar
    ai = ari[L:, :]                                  # Ai
    # out[c] = Ar X[c] Ar + Ai X[c] Ai  (since A^T = conj(A)); the sublane
    # slices of u are vreg-aligned row selections -> free.
    out = (jnp.dot(u[:M, :], ar, preferred_element_type=jnp.float32)
           + jnp.dot(u[M:, :], ai, preferred_element_type=jnp.float32))
    o_ref[0] = out.astype(o_ref.dtype)


class FFTMaskPallas:
    def __init__(self, length=64):
        assert math.log2(length).is_integer(), "length must be a power of 2"
        self.length = length
        self.F = length // 2 + 1
        self.G = int(math.log2(length))
        self.m = jnp.asarray(_build_group_to_freq_matrix(length))
        wr, wi = _dft_matrices(length)
        self.wr = jnp.asarray(wr)
        self.wi = jnp.asarray(wi)

    # ---- mask / factor construction (cheap glue, stays in plain JAX) ----------

    def _freq_vector(self, group_masks):
        """(B, G) group masks -> (B, L) mirrored per-frequency mask vector v."""
        v = group_masks.astype(jnp.float32) @ self.m                   # (B, F)
        return jnp.concatenate([v, v[:, 1:-1][:, ::-1]], axis=1)      # (B, L)

    def full_mask(self, group_masks):
        """Full (B, L, L) Hermitian-mirrored mask (== outer(v, v)); for reference."""
        v = self._freq_vector(group_masks)
        return v[:, :, None] * v[:, None, :]

    def _factors(self, group_masks, c_blk):
        """A = (conj(W)/L) diag(v) W.  Returns bf16 factors:
             bd  = (B, 2*c_blk*L, c_blk*L) = [blockdiag_c(Ar); blockdiag_c(Ai)]
             ari = (B, 2L, L)              = [Ar; Ai]
           Only Ar, Ai are needed since A^T = conj(A) (W is symmetric)."""
        L = self.length
        B = group_masks.shape[0]
        v = self._freq_vector(group_masks)                             # (B, L)
        svr = v[:, :, None] * self.wr[None]                            # diag(v) Wr
        svi = v[:, :, None] * self.wi[None]                            # diag(v) Wi
        ar = (jnp.einsum("jk,bkl->bjl", self.wr, svr)
              + jnp.einsum("jk,bkl->bjl", self.wi, svi)) / L
        ai = (jnp.einsum("jk,bkl->bjl", self.wr, svi)
              - jnp.einsum("jk,bkl->bjl", self.wi, svr)) / L
        ari = jnp.concatenate([ar, ai], axis=1).astype(jnp.bfloat16)   # (B, 2L, L)
        eye = jnp.eye(c_blk, dtype=jnp.float32)
        bd_ar = (eye[None, :, None, :, None] * ar[:, None, :, None, :]
                 ).reshape(B, c_blk * L, c_blk * L)
        bd_ai = (eye[None, :, None, :, None] * ai[:, None, :, None, :]
                 ).reshape(B, c_blk * L, c_blk * L)
        bd = jnp.concatenate([bd_ar, bd_ai], axis=1).astype(jnp.bfloat16)
        return bd, ari

    # ---- forward --------------------------------------------------------------

    def __call__(self, x, provided_group_masks=None, key=None):
        assert x.ndim == 4, "x must have 4 dimensions"
        B, C, H, W = x.shape
        assert H == self.length and W == self.length, "input size must match FFT Length"
        L = self.length
        dtype = x.dtype

        if provided_group_masks is None:
            # TODO(synk): torch.rand RNG stream is not reproducible in JAX; same
            # semantics (per-batch threshold vs. per-group scores), different numbers.
            key = jax.random.PRNGKey(0) if key is None else key
            kt, ks = jax.random.split(key)
            thresholds = jax.random.uniform(kt, (B, 1), dtype=jnp.float32)
            scores = jax.random.uniform(ks, (B, self.G), dtype=jnp.float32)
            group_masks = (scores > thresholds).astype(jnp.float32)
        else:
            group_masks = provided_group_masks

        c_blk = _pick_channel_block(C, L, B)
        n_cb = C // c_blk
        M = c_blk * L

        bd, ari = self._factors(group_masks, c_blk)       # bf16 factors
        x_rows = x.reshape(B, C * L, L)                   # free bitcast (contiguous dims)

        itemsize = jnp.dtype(dtype).itemsize
        flops = B * n_cb * (2 * (2 * M) * M * L + 2 * (2 * M * L * L))
        bytes_accessed = 2 * B * C * L * L * itemsize + B * (4 * M * M + 4 * L * L)

        out_rows = pl.pallas_call(
            _fftmask_kernel,
            out_shape=jax.ShapeDtypeStruct((B, C * L, L), dtype),
            grid=(B, n_cb),
            in_specs=[
                pl.BlockSpec((1, M, L), lambda b, cb: (b, cb, 0)),        # x rows
                pl.BlockSpec((1, 2 * M, M), lambda b, cb: (b, 0, 0)),     # [BD(Ar); BD(Ai)]
                pl.BlockSpec((1, 2 * L, L), lambda b, cb: (b, 0, 0)),     # [Ar; Ai]
            ],
            out_specs=pl.BlockSpec((1, M, L), lambda b, cb: (b, cb, 0)),
            compiler_params=pltpu.CompilerParams(
                dimension_semantics=("parallel", "parallel")),
            cost_estimate=pl.CostEstimate(
                flops=int(flops), transcendentals=0,
                bytes_accessed=int(bytes_accessed)),
        )(x_rows, bd, ari)

        # Row-stacked result is already in NCHW row order -> free bitcast reshape
        # (the v2 post-kernel HBM transpose pass is gone).
        return out_rows.reshape(B, C, L, L)


if __name__ == "__main__":
    B, C, L = 2, 4, 64
    key = jax.random.PRNGKey(0)
    kx, kg = jax.random.split(key)

    x = jax.random.normal(kx, (B, C, L, L), dtype=jnp.float32)
    mod = FFTMaskPallas(length=L)
    # Deterministic 0/1 group masks (B, G) == the provided_group_masks path.
    group_masks = (jax.random.uniform(kg, (B, mod.G)) > 0.5).astype(jnp.float32)

    out = mod(x, provided_group_masks=group_masks)
    jax.block_until_ready(out)

    # Sanity check against the plain-JAX FFT reference of the same math
    # (bf16 MXU operands with f32 accumulation -> modest tolerance).
    full_mask = mod.full_mask(group_masks)
    ref = jnp.real(jnp.fft.ifft2(full_mask[:, None, :, :] * jnp.fft.fft2(x)))
    err = float(jnp.max(jnp.abs(out - ref)))
    if err > 5e-2:
        raise AssertionError(f"Pallas kernel mismatch vs FFT reference: max abs err {err}")

    print("KERNEL_OK")
</pallas_src>

<mosaic_0001>
module attributes {stable_mosaic.version = 11 : i64} {
  func.func @_fftmask_kernel(%arg0: i32, %arg1: i32, %arg2: memref<1x256x64xf32, #tpu.memory_space<vmem>>, %arg3: memref<1x512x256xbf16, #tpu.memory_space<vmem>>, %arg4: memref<1x128x64xbf16, #tpu.memory_space<vmem>>, %arg5: memref<1x256x64xf32, #tpu.memory_space<vmem>>) attributes {dimension_semantics = [#tpu.dimension_semantics<parallel>, #tpu.dimension_semantics<parallel>], iteration_bounds = array<i64: 2, 1>, scalar_prefetch = 0 : i64, scratch_operands = 0 : i64, tpu.core_type = #tpu.core_type<tc>, window_params = [{transform_indices = @transform_0, window_bounds = array<i64: 1, 256, 64>}, {transform_indices = @transform_1, window_bounds = array<i64: 1, 512, 256>}, {transform_indices = @transform_2, window_bounds = array<i64: 1, 128, 64>}, {transform_indices = @transform_3, window_bounds = array<i64: 1, 256, 64>}]} {
    %c0 = arith.constant 0 : index
    %c0_0 = arith.constant 0 : index
    %c0_1 = arith.constant 0 : index
    %0 = vector.load %arg2[%c0, %c0_0, %c0_1] : memref<1x256x64xf32, #tpu.memory_space<vmem>>, vector<1x256x64xf32>
    %1 = vector.shape_cast %0 : vector<1x256x64xf32> to vector<256x64xf32>
    %2 = arith.truncf %1 : vector<256x64xf32> to vector<256x64xbf16>
    %c0_2 = arith.constant 0 : index
    %c0_3 = arith.constant 0 : index
    %c0_4 = arith.constant 0 : index
    %3 = vector.load %arg3[%c0_2, %c0_3, %c0_4] : memref<1x512x256xbf16, #tpu.memory_space<vmem>>, vector<1x512x256xbf16>
    %4 = vector.shape_cast %3 : vector<1x512x256xbf16> to vector<512x256xbf16>
    %cst = arith.constant dense<0.000000e+00> : vector<512x64xf32>
    %5 = tpu.matmul %4, %2, %cst {dimension_numbers = #tpu.dot_dimension_numbers<[1], [0], [0], [1], [0, 0, 1, 1], [], []>} : vector<512x256xbf16>, vector<256x64xbf16>, vector<512x64xf32> -> vector<512x64xf32>
    %6 = arith.truncf %5 : vector<512x64xf32> to vector<512x64xbf16>
    %c0_5 = arith.constant 0 : index
    %c0_6 = arith.constant 0 : index
    %c0_7 = arith.constant 0 : index
    %7 = vector.load %arg4[%c0_5, %c0_6, %c0_7] : memref<1x128x64xbf16, #tpu.memory_space<vmem>>, vector<1x128x64xbf16>
    %8 = vector.shape_cast %7 : vector<1x128x64xbf16> to vector<128x64xbf16>
    %9 = vector.extract_strided_slice %8 {offsets = [0, 0], sizes = [64, 64], strides = [1, 1]} : vector<128x64xbf16> to vector<64x64xbf16>
    %10 = vector.extract_strided_slice %8 {offsets = [64, 0], sizes = [64, 64], strides = [1, 1]} : vector<128x64xbf16> to vector<64x64xbf16>
    %11 = vector.extract_strided_slice %6 {offsets = [0, 0], sizes = [256, 64], strides = [1, 1]} : vector<512x64xbf16> to vector<256x64xbf16>
    %cst_8 = arith.constant dense<0.000000e+00> : vector<256x64xf32>
    %12 = tpu.matmul %11, %9, %cst_8 {dimension_numbers = #tpu.dot_dimension_numbers<[1], [0], [0], [1], [0, 0, 1, 1], [], []>} : vector<256x64xbf16>, vector<64x64xbf16>, vector<256x64xf32> -> vector<256x64xf32>
    %13 = vector.extract_strided_slice %6 {offsets = [256, 0], sizes = [256, 64], strides = [1, 1]} : vector<512x64xbf16> to vector<256x64xbf16>
    %cst_9 = arith.constant dense<0.000000e+00> : vector<256x64xf32>
    %14 = tpu.matmul %13, %10, %cst_9 {dimension_numbers = #tpu.dot_dimension_numbers<[1], [0], [0], [1], [0, 0, 1, 1], [], []>} : vector<256x64xbf16>, vector<64x64xbf16>, vector<256x64xf32> -> vector<256x64xf32>
    %15 = arith.addf %12, %14 : vector<256x64xf32>
    %c0_10 = arith.constant 0 : index
    %c0_11 = arith.constant 0 : index
    %c0_12 = arith.constant 0 : index
    %16 = vector.load %arg5[%c0_10, %c0_11, %c0_12] : memref<1x256x64xf32, #tpu.memory_space<vmem>>, vector<1x256x64xf32>
    %17 = vector.shape_cast %16 : vector<1x256x64xf32> to vector<256x64xf32>
    %18 = vector.shape_cast %15 : vector<256x64xf32> to vector<1x256x64xf32>
    tpu.vector_store %arg5[%c0_10, %c0_11, %c0_12], %18 {strides = array<i32>} : memref<1x256x64xf32, #tpu.memory_space<vmem>>, vector<1x256x64xf32>,
    return
  }
  func.func @transform_0(%arg0: i32, %arg1: i32) -> (i32, i32, i32) {
    %c0_i32 = arith.constant 0 : i32
    %c0_i32_0 = arith.constant 0 : i32
    return %arg0, %arg1, %c0_i32 : i32, i32, i32
  }
  func.func @transform_1(%arg0: i32, %arg1: i32) -> (i32, i32, i32) {
    %c0_i32 = arith.constant 0 : i32
    %c0_i32_0 = arith.constant 0 : i32
    %c0_i32_1 = arith.constant 0 : i32
    return %arg0, %c0_i32, %c0_i32_0 : i32, i32, i32
  }
  func.func @transform_2(%arg0: i32, %arg1: i32) -> (i32, i32, i32) {
    %c0_i32 = arith.constant 0 : i32
    %c0_i32_0 = arith.constant 0 : i32
    %c0_i32_1 = arith.constant 0 : i32
    return %arg0, %c0_i32, %c0_i32_0 : i32, i32, i32
  }
  func.func @transform_3(%arg0: i32, %arg1: i32) -> (i32, i32, i32) {
    %c0_i32 = arith.constant 0 : i32
    %c0_i32_0 = arith.constant 0 : i32
    return %arg0, %arg1, %c0_i32 : i32, i32, i32
  }
}

</mosaic_0001>

<bundles_post_ra>
// kernel: tpu_custom_call.1
= control target key start
LH: loop header
LB: loop body
LE: loop exit
PB: predicated region body
PF: predicated region fallthrough
CT: control target
= control target key end

     0   :  { %8 = vsyncpa [#allocation3], 0  ;;  %s2836_s0 = inlined_call_operand.vmem [shape: f32[2,256,64], index: 0, kind: input, shape index: {}]   ;;  %s2837_s1 = inlined_call_operand.hbm [shape: bf16[2,512,256], index: 1, kind: input, shape index: {}]   ;;  %s2838_s2 = inlined_call_operand.vmem [shape: bf16[2,128,64], index: 2, kind: input, shape index: {}]   ;;  %s2839_s3 = inlined_call_operand.vmem [shape: f32[2,256,64], index: 3, kind: output, shape index: {}]  }
   0x1   :  { %10 = vsyncpa [#allocation3 + $0x1], 0  ;;  %s2238_s12 = smov 0   ;;  %s2240_s13 = smov 0  }
   0x2   :  { %s2242_s14 = smov 0   ;;  %s2244_s15 = smov 0  }
   0x3   :  { %s2246_s16 = smov 0   ;;  %s2248_s17 = smov 0  }
   0x4 LB: > { %s1661_s18 = sadd.s32 4294967295, %s2212_s17   ;;  %s28_s19 = sadd.s32 1, %s2208_s16  ;;  %s2212_s17 = sphi %s2248_s17, %s16_s17   ;;  %s2208_s16 = sphi %s2246_s16, %s2871_s16   ;;  %s2204_s15 = sphi %s2244_s15, %s2870_s15   ;;  %s2200_s14 = sphi %s2242_s14, %s2869_s14   ;;  %s2196_s13 = sphi %s2240_s13, %s2868_s13   ;;  %s2192_s12 = sphi %s2238_s12, %s2867_s12  }
   0x5   : > { %p30_p0 = scmp.ge.s32.totalorder %s28_s19, 2  ;;  %s63_s20 = sadd.s32 1, %s2200_s14 }
   0x6   : > { %p70_p1 = scmp.ne.s32.totalorder %s2200_s14, %s2196_s13  ;;  %p71_p2 = scmp.eq.s32.totalorder %s2212_s17, 0 }
   0x7   : > { %s2873_s19 = smov (%p30_p0, %s28_s19), 0  ;;  %p76_p4 = scmp.ne.s32.totalorder %s2196_s13, %s2192_s12 }
   0x8   : > { %p2274_p3 = por %p71_p2, %p70_p1  ;;  %s60_s22 = ssub.s32 %s2208_s16, %s2873_s19 }
   0x9   : > { %p77_p5 = scmp.eq.s32.totalorder %s1661_s18, 0  ;;  %p61_p6 = scmp.eq.s32.totalorder %s60_s22, 0 }
   0xa   : > { %p1976_p8 = scmp.lt.s32.totalorder %s2212_s17, 2  ;;  %s167_s25 = sand.u32 1, %s2200_s14  }
   0xb   : > { %p2281_p7 = por %p77_p5, %p76_p4  ;;  %s1782_s26 = sshll.u32 %s2208_s16, 13 }
   0xc   : > { %s2287_s24 = scalar_select %p61_p6, %s2200_s14, %s63_s20  }
   0xd   : > { %s1665_s27 = sshll.u32 %s167_s25, 9  ;;  %s2294_s30 = scalar_lea.hbm %s2837_s1, %s1782_s26 }
   0xe   : > { %s171_s4 = scalar_lea.vmem [#allocation2], %s1665_s27  ;;  %p2298_p9 = pnand %p1976_p8, %p2274_p3 }
   0xf   : > { %s178_s5 = sshll.u32 %s171_s4, 4  ;;  %s2304_s7 = scalar_lea.sflag [#allocation3], %s167_s25  ;;  %s2302_s5 = int_to_ptr.vmem [resolvable:$true] %s178_s5 }
  0x10   : > { %s2132_s8 = scalar_lea.hbm %s2294_s30, 8192  ;;  %p2134_p11 = pneg %p2298_p9 }
  0x11   : > { %p2133_p10 = scmp.ne.s32.totalorder %s2294_s30, %s2132_s8  ;;  %s2137_s11 = scalar_lea.hbm %s2837_s1, 16384 }
  0x12   : > { %p2138_p0 = scmp.lt.u32.totalorder %s2294_s30, %s2837_s1  ;;  %p2139_p1 = scmp.lt.u32.totalorder %s2137_s11, %s2132_s8 }
  0x13   : > { %p2135_p12 = pnand %p2134_p11, %p2133_p10  ;;  %p2141_p3 = scmp.lt.u32.totalorder %s2132_s8, %s2294_s30 }
  0x14   : > { %p2140_p2 = por %p2139_p1, %p2138_p0 }
  0x15   : > { %p2136_p13 = pneg %p2135_p12 }
  0x16   : > { %p2142_p4 = por %p2141_p3, %p2140_p2 }
  0x18   : > { %p2143_p5 = pnand %p2142_p4, %p2136_p13 }
  0x1a   : > { %2146 = shalt.err (!%p2143_p5)
}
  0x1b   : > { %s2147_s20 = scalar_lea.vmem %s2302_s5, 8192  ;;  %s2214_s21 = smov [#allocation2]  }
  0x1c   : > { %p2148_p6 = scmp.ne.s32.totalorder %s2302_s5, %s2147_s20  ;;  %s2152_s22 = sshll.u32 %s2214_s21, 4  ;;  %s2153_s22 = int_to_ptr.vmem [resolvable:$false] %s2152_s22 }
  0x1d   : > { %s2154_s25 = scalar_lea.vmem %s2153_s22, 16384  ;;  %p2155_p12 = scmp.lt.s32.totalorder %s2302_s5, %s2153_s22 }
  0x1e   : > { %p2150_p8 = pnand %p2148_p6, %p2134_p11  ;;  %p2156_p0 = scmp.lt.s32.totalorder %s2154_s25, %s2147_s20 }
  0x20   : > { %p2151_p10 = pneg %p2150_p8  ;;  %p2157_p1 = por %p2156_p0, %p2155_p12 }
  0x22   : > { %p2158_p2 = pnand %p2157_p1, %p2151_p10 }
  0x24   : > { %2161 = shalt.err (!%p2158_p2)
}
  0x25   : > { %s2215_s26 = smov 128   ;;  %s2216_s27 = smov 8  }
  0x26   : > { %1975 = dma.hbm_to_vmem [thread:$0]  (!%p2298_p9), %s2294_s30, 8192, %s2302_s5, %s2304_s7, %s2215_s26, %s2215_s26, %s2216_s27  }
  0x27   : > { %p1668_p11 = scmp.ge.s32.totalorder %s2212_s17, 1  ;;  %p194_p13 = scmp.lt.s32.totalorder %s2212_s17, 3 }
  0x29   : > { %p195_p3 = pnand %p1668_p11, %p194_p13 }
  0x2a   : > { %s200_s28 = sand.u32 (!%p195_p3), 1, %s2196_s13  }
  0x2b   : > { %198 = sbr.rel (%p195_p3) target bundleno = 834 (0x342), region = 32  ;;  %s1669_s29 = sshll.u32 (!%p195_p3), %s200_s28, 9 }
  0x2c   : > { %s201_s4 = scalar_lea.sflag (!%p195_p3), [#allocation3], %s200_s28  ;;  %s2335_s8 = scalar_lea.vmem (!%p195_p3), [#allocation2], %s1669_s29 }
  0x32   : > { %2187 = dma.done.wait (%p2281_p7), %s201_s4, 8192  }
  0x33   : > { %2189 = vsyncadd (%p2281_p7), %s201_s4, 4294959104  ;;  %p246_p4 = scmp.lt.s32.totalorder %s2204_s15, 1  ;;  %v2217_v0 = vmov 0   ;;  %v2030_v14 = vld [vmem:[%s2335_s8 + $0x4] ss:$8 sps:$4 sm:$0xff]   ;;  %vm1064_vm0 = vcmask 523264  }
  0x34   : > { %703 = vmatprep.subr.bf16.mxu0 %v2217_v0  ;;  %1906 = vmatprep.subr.bf16.mxu1 %v2217_v0  ;;  %v2028_v50 = vld [vmem:[%s2335_s8] ss:$8 sps:$4 sm:$0xff]   ;;  %v2031_v51 = vld [vmem:[%s2335_s8 + $0x14] ss:$8 sps:$4 sm:$0xff]   ;;  %v2033_v52 = vld [vmem:[%s2335_s8 + $0x10] ss:$8 sps:$4 sm:$0xff]  }
  0x35   : > { %s2875_s15 = smov (!%p246_p4, %s2204_s15), 1  ;;  %735 = vmatprep.mubr.bf16.mxu0 %v2030_v14  ;;  %v2034_v53 = vld [vmem:[%s2335_s8 + $0x24] ss:$8 sps:$4 sm:$0xff]   ;;  %v2036_v54 = vld [vmem:[%s2335_s8 + $0x20] ss:$8 sps:$4 sm:$0xff]  }
  0x36   : > { %s1783_s30 = sshll.u32 %s2875_s15, 8  ;;  %v2037_v55 = vld [vmem:[%s2335_s8 + $0x34] ss:$8 sps:$4 sm:$0xff]   ;;  %v2039_v56 = vld [vmem:[%s2335_s8 + $0x30] ss:$8 sps:$4 sm:$0xff]   ;;  %s1784_s23 = sshll.u32 %s2875_s15, 6 }
  0x37   : > { %s2353_s7 = scalar_lea.vmem %s2836_s0, %s1783_s30  ;;  %v2040_v57 = vld [vmem:[%s2335_s8 + $0x44] ss:$8 sps:$4 sm:$0xff]   ;;  %v2088_v58 = vld [vmem:[%s2335_s8 + $0x180] ss:$8 sps:$4 sm:$0xff]   ;;  %v2043_v61 = vld [vmem:[%s2335_s8 + $0x54] ss:$8 sps:$4 sm:$0xff]   ;;  %s2485_s11 = scalar_lea.vmem %s2838_s2, %s1784_s23 }
  0x38   : > { %v271_v1 = vld [vmem:[%s2353_s7] sm:$0xff]  ;;  %v272_v2 = vld [vmem:[%s2353_s7 + $0x8] sm:$0xff]  ;;  %v273_v3 = vld [vmem:[%s2353_s7 + $0x10] sm:$0xff]  ;;  %s2752_s20 = scalar_lea.vmem %s2839_s3, %s1783_s30 }
  0x39   : > { %v303_v4 = vpack.c.bf16 %v272_v2, %v271_v1  ;;  %v274_v5 = vld [vmem:[%s2353_s7 + $0x18] sm:$0xff]  ;;  %v275_v7 = vld [vmem:[%s2353_s7 + $0x20] sm:$0xff]  ;;  %v276_v8 = vld [vmem:[%s2353_s7 + $0x28] sm:$0xff] }
  0x3a   : > { %v304_v6 = vpack.c.bf16 %v274_v5, %v273_v3  ;;  %v305_v9 = vpack.c.bf16 %v276_v8, %v275_v7  ;;  %v277_v10 = vld [vmem:[%s2353_s7 + $0x30] sm:$0xff]  ;;  %v278_v11 = vld [vmem:[%s2353_s7 + $0x38] sm:$0xff]  ;;  %v279_v13 = vld [vmem:[%s2353_s7 + $0x40] sm:$0xff] }
  0x3b   : > { %704 = vmatpush1.bf16.msra.mxu0 %v303_v4  ;;  %1922 = vmatpush1.bf16.msra.mxu1 %v303_v4  ;;  %v306_v12 = vpack.c.bf16 %v278_v11, %v277_v10  ;;  %v280_v15 = vld [vmem:[%s2353_s7 + $0x48] sm:$0xff]  ;;  %v281_v17 = vld [vmem:[%s2353_s7 + $0x50] sm:$0xff]  ;;  %v282_v18 = vld [vmem:[%s2353_s7 + $0x58] sm:$0xff] }
  0x3c   : > { %705 = vmatprep.subr.bf16.mxu0 %v2217_v0  ;;  %1907 = vmatprep.subr.bf16.mxu1 %v2217_v0  ;;  %v307_v16 = vpack.c.bf16 %v280_v15, %v279_v13  ;;  %v308_v19 = vpack.c.bf16 %v282_v18, %v281_v17  ;;  %v283_v20 = vld [vmem:[%s2353_s7 + $0x60] sm:$0xff]  ;;  %v284_v21 = vld [vmem:[%s2353_s7 + $0x68] sm:$0xff]  ;;  %v285_v23 = vld [vmem:[%s2353_s7 + $0x70] sm:$0xff] }
  0x3d   : > { %v309_v22 = vpack.c.bf16 %v284_v21, %v283_v20  ;;  %v286_v24 = vld [vmem:[%s2353_s7 + $0x78] sm:$0xff]  ;;  %v287_v26 = vld [vmem:[%s2353_s7 + $0x80] sm:$0xff]  ;;  %v288_v27 = vld [vmem:[%s2353_s7 + $0x88] sm:$0xff] }
  0x3e   : > { %v310_v25 = vpack.c.bf16 %v286_v24, %v285_v23  ;;  %v289_v28 = vld [vmem:[%s2353_s7 + $0x90] sm:$0xff]  ;;  %v290_v29 = vld [vmem:[%s2353_s7 + $0x98] sm:$0xff]  ;;  %v311_v30 = vpack.c.bf16 %v288_v27, %v287_v26  ;;  %v291_v31 = vld [vmem:[%s2353_s7 + $0xa0] sm:$0xff] }
  0x3f   : > { %706 = vmatpush1.bf16.msra.mxu0 %v304_v6  ;;  %1923 = vmatpush1.bf16.msra.mxu1 %v304_v6  ;;  %v312_v32 = vpack.c.bf16 %v290_v29, %v289_v28  ;;  %v292_v33 = vld [vmem:[%s2353_s7 + $0xa8] sm:$0xff]  ;;  %v293_v34 = vld [vmem:[%s2353_s7 + $0xb0] sm:$0xff]  ;;  %v294_v35 = vld [vmem:[%s2353_s7 + $0xb8] sm:$0xff] }
  0x40   : > { %707 = vmatprep.subr.bf16.mxu0 %v2217_v0  ;;  %1908 = vmatprep.subr.bf16.mxu1 %v2217_v0  ;;  %v313_v36 = vpack.c.bf16 %v292_v33, %v291_v31  ;;  %v314_v37 = vpack.c.bf16 %v294_v35, %v293_v34  ;;  %v295_v38 = vld [vmem:[%s2353_s7 + $0xc0] sm:$0xff]  ;;  %v296_v39 = vld [vmem:[%s2353_s7 + $0xc8] sm:$0xff]  ;;  %v297_v41 = vld [vmem:[%s2353_s7 + $0xd0] sm:$0xff] }
  0x41   : > { %v315_v40 = vpack.c.bf16 %v296_v39, %v295_v38  ;;  %v298_v42 = vld [vmem:[%s2353_s7 + $0xd8] sm:$0xff]  ;;  %v299_v44 = vld [vmem:[%s2353_s7 + $0xe0] sm:$0xff]  ;;  %v300_v45 = vld [vmem:[%s2353_s7 + $0xe8] sm:$0xff] }
  0x42   : > { %v316_v43 = vpack.c.bf16 %v298_v42, %v297_v41  ;;  %v317_v46 = vpack.c.bf16 %v300_v45, %v299_v44  ;;  %v301_v47 = vld [vmem:[%s2353_s7 + $0xf0] sm:$0xff]  ;;  %v302_v48 = vld [vmem:[%s2353_s7 + $0xf8] sm:$0xff]  ;;  %v2090_v59 = vld [vmem:[%s2335_s8 + $0x184] ss:$8 sps:$4 sm:$0xff]  }
  0x43   : > { %708 = vmatpush1.bf16.msra.mxu0 %v305_v9  ;;  %1924 = vmatpush1.bf16.msra.mxu1 %v305_v9  ;;  %v318_v49 = vpack.c.bf16 %v302_v48, %v301_v47  ;;  %v2042_v60 = vld [vmem:[%s2335_s8 + $0x40] ss:$8 sps:$4 sm:$0xff]   ;;  %v2094_v62 = vld [vmem:[%s2335_s8 + $0x194] ss:$8 sps:$4 sm:$0xff]   ;;  %v2096_v63 = vld [vmem:[%s2335_s8 + $0x190] ss:$8 sps:$4 sm:$0xff]  }
  0x44   : > { %709 = vmatprep.subr.bf16.mxu0 %v2217_v0  ;;  %1909 = vmatprep.subr.bf16.mxu1 %v2217_v0  ;;  %v2046_v1 = vld [vmem:[%s2335_s8 + $0x64] ss:$8 sps:$4 sm:$0xff]   ;;  %v2102_v3 = vld [vmem:[%s2335_s8 + $0x1a0] ss:$8 sps:$4 sm:$0xff]   ;;  %v2049_v5 = vld [vmem:[%s2335_s8 + $0x74] ss:$8 sps:$4 sm:$0xff]  }
  0x45   : > { %927 = vmatprep.mubr.bf16.mxu1 %v2090_v59  ;;  %v2100_v2 = vld [vmem:[%s2335_s8 + $0x1a4] ss:$8 sps:$4 sm:$0xff]   ;;  %v2048_v4 = vld [vmem:[%s2335_s8 + $0x60] ss:$8 sps:$4 sm:$0xff]   ;;  %v2106_v6 = vld [vmem:[%s2335_s8 + $0x1b4] ss:$8 sps:$4 sm:$0xff]  }
  0x46   : > { %v2108_v7 = vld [vmem:[%s2335_s8 + $0x1b0] ss:$8 sps:$4 sm:$0xff]   ;;  %v2052_v9 = vld [vmem:[%s2335_s8 + $0x84] ss:$8 sps:$4 sm:$0xff]   ;;  %v2114_v11 = vld [vmem:[%s2335_s8 + $0x1c0] ss:$8 sps:$4 sm:$0xff]  }
  0x47   : > { %710 = vmatpush1.bf16.msra.mxu0 %v306_v12  ;;  %1925 = vmatpush1.bf16.msra.mxu1 %v306_v12  ;;  %v2051_v8 = vld [vmem:[%s2335_s8 + $0x70] ss:$8 sps:$4 sm:$0xff]   ;;  %v2112_v10 = vld [vmem:[%s2335_s8 + $0x1c4] ss:$8 sps:$4 sm:$0xff]   ;;  %v2115_v12 = vld [vmem:[%s2335_s8 + $0x1d4] ss:$8 sps:$4 sm:$0xff]  }
  0x48   : > { %711 = vmatprep.subr.bf16.mxu0 %v2217_v0  ;;  %1910 = vmatprep.subr.bf16.mxu1 %v2217_v0  ;;  %v2054_v13 = vld [vmem:[%s2335_s8 + $0x80] ss:$8 sps:$4 sm:$0xff]   ;;  %v2055_v14 = vld [vmem:[%s2335_s8 + $0x94] ss:$8 sps:$4 sm:$0xff]   ;;  %v2117_v15 = vld [vmem:[%s2335_s8 + $0x1d0] ss:$8 sps:$4 sm:$0xff]  }
  0x49   : > { %v2057_v17 = vld [vmem:[%s2335_s8 + $0x90] ss:$8 sps:$4 sm:$0xff]   ;;  %v2058_v18 = vld [vmem:[%s2335_s8 + $0xa4] ss:$8 sps:$4 sm:$0xff]   ;;  %v2060_v20 = vld [vmem:[%s2335_s8 + $0xa0] ss:$8 sps:$4 sm:$0xff]  }
  0x4a   : > { %v2061_v21 = vld [vmem:[%s2335_s8 + $0xb4] ss:$8 sps:$4 sm:$0xff]   ;;  %v2123_v23 = vld [vmem:[%s2335_s8 + $0x1f0] ss:$8 sps:$4 sm:$0xff]   ;;  %v2066_v26 = vld [vmem:[%s2335_s8 + $0xc0] ss:$8 sps:$4 sm:$0xff]  }
  0x4b   : > { %712 = vmatpush1.bf16.msra.mxu0 %v307_v16  ;;  %1926 = vmatpush1.bf16.msra.mxu1 %v307_v16  ;;  %v2118_v16 = vld [vmem:[%s2335_s8 + $0x1e4] ss:$8 sps:$4 sm:$0xff]   ;;  %v2063_v24 = vld [vmem:[%s2335_s8 + $0xb0] ss:$8 sps:$4 sm:$0xff]   ;;  %v2067_v27 = vld [vmem:[%s2335_s8 + $0xd4] ss:$8 sps:$4 sm:$0xff]  }
  0x4c   : > { %713 = vmatprep.subr.bf16.mxu0 %v2217_v0  ;;  %1911 = vmatprep.subr.bf16.mxu1 %v2217_v0  ;;  %v2069_v28 = vld [vmem:[%s2335_s8 + $0xd0] ss:$8 sps:$4 sm:$0xff]   ;;  %v2070_v29 = vld [vmem:[%s2335_s8 + $0xe4] ss:$8 sps:$4 sm:$0xff]   ;;  %v2073_v31 = vld [vmem:[%s2335_s8 + $0xf4] ss:$8 sps:$4 sm:$0xff]  }
  0x4d   : > { %v2076_v33 = vld [vmem:[%s2335_s8 + $0x104] ss:$8 sps:$4 sm:$0xff]   ;;  %v2078_v34 = vld [vmem:[%s2335_s8 + $0x100] ss:$8 sps:$4 sm:$0xff]   ;;  %v2079_v35 = vld [vmem:[%s2335_s8 + $0x114] ss:$8 sps:$4 sm:$0xff]  }
  0x4e   : > { %v2084_v38 = vld [vmem:[%s2335_s8 + $0x120] ss:$8 sps:$4 sm:$0xff]   ;;  %v2085_v39 = vld [vmem:[%s2335_s8 + $0x134] ss:$8 sps:$4 sm:$0xff]   ;;  %v2091_v41 = vld [vmem:[%s2335_s8 + $0x144] ss:$8 sps:$4 sm:$0xff]  }
  0x4f   : > { %714 = vmatpush1.bf16.msra.mxu0 %v308_v19  ;;  %1927 = vmatpush1.bf16.msra.mxu1 %v308_v19  ;;  %v2120_v19 = vld [vmem:[%s2335_s8 + $0x1e0] ss:$8 sps:$4 sm:$0xff]   ;;  %v2099_v44 = vld [vmem:[%s2335_s8 + $0x150] ss:$8 sps:$4 sm:$0xff]   ;;  %v2103_v45 = vld [vmem:[%s2335_s8 + $0x164] ss:$8 sps:$4 sm:$0xff]  }
  0x50   : > { %715 = vmatprep.subr.bf16.mxu0 %v2217_v0  ;;  %1912 = vmatprep.subr.bf16.mxu1 %v2217_v0  ;;  %v2093_v42 = vld [vmem:[%s2335_s8 + $0x140] ss:$8 sps:$4 sm:$0xff]   ;;  %v2109_v47 = vld [vmem:[%s2335_s8 + $0x174] ss:$8 sps:$4 sm:$0xff]   ;;  %v2111_v48 = vld [vmem:[%s2335_s8 + $0x170] ss:$8 sps:$4 sm:$0xff]  }
  0x53   : > { %716 = vmatpush1.bf16.msra.mxu0 %v309_v22  ;;  %1928 = vmatpush1.bf16.msra.mxu1 %v309_v22  ;;  %v2121_v22 = vld [vmem:[%s2335_s8 + $0x1f4] ss:$8 sps:$4 sm:$0xff]  }
  0x54   : > { %717 = vmatprep.subr.bf16.mxu0 %v2217_v0  ;;  %1913 = vmatprep.subr.bf16.mxu1 %v2217_v0 }
  0x57   : > { %718 = vmatpush1.bf16.msra.mxu0 %v310_v25  ;;  %1929 = vmatpush1.bf16.msra.mxu1 %v310_v25  ;;  %v2064_v25 = vld [vmem:[%s2335_s8 + $0xc4] ss:$8 sps:$4 sm:$0xff]  }
  0x58   : > { %719 = vmatprep.subr.bf16.mxu0 %v2217_v0  ;;  %1914 = vmatprep.subr.bf16.mxu1 %v2217_v0 }
  0x5b   : > { %720 = vmatpush1.bf16.msra.mxu0 %v311_v30  ;;  %1930 = vmatpush1.bf16.msra.mxu1 %v311_v30  ;;  %v2072_v30 = vld [vmem:[%s2335_s8 + $0xe0] ss:$8 sps:$4 sm:$0xff]  }
  0x5c   : > { %721 = vmatprep.subr.bf16.mxu0 %v2217_v0  ;;  %1915 = vmatprep.subr.bf16.mxu1 %v2217_v0 }
  0x5f   : > { %722 = vmatpush1.bf16.msra.mxu0 %v312_v32  ;;  %1931 = vmatpush1.bf16.msra.mxu1 %v312_v32  ;;  %v2075_v32 = vld [vmem:[%s2335_s8 + $0xf0] ss:$8 sps:$4 sm:$0xff]  }
  0x60   : > { %723 = vmatprep.subr.bf16.mxu0 %v2217_v0  ;;  %1916 = vmatprep.subr.bf16.mxu1 %v2217_v0 }
  0x63   : > { %724 = vmatpush1.bf16.msra.mxu0 %v313_v36  ;;  %1932 = vmatpush1.bf16.msra.mxu1 %v313_v36  ;;  %v2081_v36 = vld [vmem:[%s2335_s8 + $0x110] ss:$8 sps:$4 sm:$0xff]  }
  0x64   : > { %725 = vmatprep.subr.bf16.mxu0 %v2217_v0  ;;  %1917 = vmatprep.subr.bf16.mxu1 %v2217_v0 }
  0x67   : > { %726 = vmatpush1.bf16.msra.mxu0 %v314_v37  ;;  %1933 = vmatpush1.bf16.msra.mxu1 %v314_v37  ;;  %v2082_v37 = vld [vmem:[%s2335_s8 + $0x124] ss:$8 sps:$4 sm:$0xff]  }
  0x68   : > { %727 = vmatprep.subr.bf16.mxu0 %v2217_v0  ;;  %1918 = vmatprep.subr.bf16.mxu1 %v2217_v0 }
  0x6b   : > { %728 = vmatpush1.bf16.msra.mxu0 %v315_v40  ;;  %1934 = vmatpush1.bf16.msra.mxu1 %v315_v40  ;;  %v2087_v40 = vld [vmem:[%s2335_s8 + $0x130] ss:$8 sps:$4 sm:$0xff]  }
  0x6c   : > { %729 = vmatprep.subr.bf16.mxu0 %v2217_v0  ;;  %1919 = vmatprep.subr.bf16.mxu1 %v2217_v0 }
  0x6f   : > { %730 = vmatpush1.bf16.msra.mxu0 %v316_v43  ;;  %1935 = vmatpush1.bf16.msra.mxu1 %v316_v43  ;;  %v2097_v43 = vld [vmem:[%s2335_s8 + $0x154] ss:$8 sps:$4 sm:$0xff]  }
  0x70   : > { %731 = vmatprep.subr.bf16.mxu0 %v2217_v0  ;;  %1920 = vmatprep.subr.bf16.mxu1 %v2217_v0 }
  0x73   : > { %732 = vmatpush1.bf16.msra.mxu0 %v317_v46  ;;  %1936 = vmatpush1.bf16.msra.mxu1 %v317_v46  ;;  %v2105_v46 = vld [vmem:[%s2335_s8 + $0x160] ss:$8 sps:$4 sm:$0xff]  }
  0x74   : > { %733 = vmatprep.subr.bf16.mxu0 %v2217_v0  ;;  %1921 = vmatprep.subr.bf16.mxu1 %v2217_v0  ;;  %v2045_v0 = vld [vmem:[%s2335_s8 + $0x50] ss:$8 sps:$4 sm:$0xff]  }
  0x77   : > { %734 = vmatpush1.bf16.msra.mxu0 %v318_v49  ;;  %1937 = vmatpush1.bf16.msra.mxu1 %v318_v49  ;;  %v2124_v49 = vld [vmem:[%s2485_s11 + $0x20] sm:$0xff]  }
  0x78   : > { %1826 = vmatprep.subr.bf16.mxu1 %v2124_v49 }
  0x7a   : > { %736 = vmatmul.mubr.bf16.vlgmr.msra.gmra.mrb[0].mxu0 %v2028_v50  ;;  %928 = vmatmul.mubr.bf16.vlgmr.msra.gmra.mrb[0].mxu1 %v2088_v58  ;;  %v2125_v50 = vld [vmem:[%s2485_s11 + $0x28] sm:$0xff]  }
  0x7b   : > { %743 = vmatprep.mubr.bf16.mxu0 %v2031_v51  ;;  %935 = vmatprep.mubr.bf16.mxu1 %v2094_v62 }
  0x7c   : > { %1827 = vmatpush3.bf16.msra.mxu1 %v2124_v49 }
  0x7d   : > { %1828 = vmatprep.subr.bf16.mxu1 %v2125_v50 }
  0x80   : > { %1829 = vmatpush3.bf16.msra.mxu1 %v2125_v50 }
  0x82   : > { %744 = vmatmul.mubr.bf16.gmra.mrb[4].mxu0 %v2033_v52  ;;  %936 = vmatmul.mubr.bf16.gmra.mrb[4].mxu1 %v2096_v63 }
  0x83   : > { %751 = vmatprep.mubr.bf16.mxu0 %v2034_v53  ;;  %943 = vmatprep.mubr.bf16.mxu1 %v2100_v2 }
  0x8a   : > { %752 = vmatmul.mubr.bf16.gmra.mrb[8].mxu0 %v2036_v54  ;;  %944 = vmatmul.mubr.bf16.gmra.mrb[8].mxu1 %v2102_v3 }
  0x8b   : > { %759 = vmatprep.mubr.bf16.mxu0 %v2037_v55  ;;  %951 = vmatprep.mubr.bf16.mxu1 %v2106_v6 }
  0x92   : > { %760 = vmatmul.mubr.bf16.gmra.mrb[12].mxu0 %v2039_v56  ;;  %952 = vmatmul.mubr.bf16.gmra.mrb[12].mxu1 %v2108_v7  ;;  %v2126_v56 = vld [vmem:[%s2485_s11 + $0x30] sm:$0xff]  }
  0x93   : > { %767 = vmatprep.mubr.bf16.mxu0 %v2040_v57  ;;  %959 = vmatprep.mubr.bf16.mxu1 %v2112_v10  ;;  %v2127_v57 = vld [vmem:[%s2485_s11 + $0x38] sm:$0xff]  }
  0x94   : > { %1830 = vmatprep.subr.bf16.mxu1 %v2126_v56 }
  0x95   : > { %1831 = vmatpush3.bf16.msra.mxu1 %v2126_v56 }
  0x96   : > { %1832 = vmatprep.subr.bf16.mxu1 %v2127_v57 }
  0x99   : > { %1833 = vmatpush3.bf16.msra.mxu1 %v2127_v57 }
  0x9a   : > { %768 = vmatmul.mubr.bf16.gmra.mrb[16].mxu0 %v2042_v60  ;;  %960 = vmatmul.mubr.bf16.gmra.mrb[16].mxu1 %v2114_v11 }
  0x9b   : > { %775 = vmatprep.mubr.bf16.mxu0 %v2043_v61  ;;  %967 = vmatprep.mubr.bf16.mxu1 %v2115_v12 }
  0xa2   : > { %776 = vmatmul.mubr.bf16.gmra.mrb[20].mxu0 %v2045_v0  ;;  %968 = vmatmul.mubr.bf16.gmra.mrb[20].mxu1 %v2117_v15 }
  0xa3   : > { %783 = vmatprep.mubr.bf16.mxu0 %v2046_v1  ;;  %975 = vmatprep.mubr.bf16.mxu1 %v2118_v16 }
  0xaa   : > { %784 = vmatmul.mubr.bf16.gmra.mrb[24].mxu0 %v2048_v4  ;;  %976 = vmatmul.mubr.bf16.gmra.mrb[24].mxu1 %v2120_v19  ;;  %v2528_v19 = vld [vmem:[%s2485_s11] sm:$0xff]  }
  0xab   : > { %791 = vmatprep.mubr.bf16.mxu0 %v2049_v5  ;;  %983 = vmatprep.mubr.bf16.mxu1 %v2121_v22 }
  0xac   : > { %1866 = vmatprep.subr.bf16.mxu1 %v2528_v19 }
  0xb2   : > { %792 = vmatmul.mubr.bf16.gmra.mrb[28].mxu0 %v2051_v8  ;;  %984 = vmatmul.mubr.bf16.gmra.mrb[28].mxu1 %v2123_v23 }
  0xb3   : > { %799 = vmatprep.mubr.bf16.mxu0 %v2052_v9 }
  0xba   : > { %800 = vmatmul.mubr.bf16.gmra.mrb[32].mxu0 %v2054_v13 }
  0xbb   : > { %807 = vmatprep.mubr.bf16.mxu0 %v2055_v14 }
  0xc2   : > { %808 = vmatmul.mubr.bf16.gmra.mrb[36].mxu0 %v2057_v17 }
  0xc3   : > { %815 = vmatprep.mubr.bf16.mxu0 %v2058_v18 }
  0xca   : > { %816 = vmatmul.mubr.bf16.gmra.mrb[40].mxu0 %v2060_v20 }
  0xcb   : > { %823 = vmatprep.mubr.bf16.mxu0 %v2061_v21 }
  0xd2   : > { %824 = vmatmul.mubr.bf16.gmra.mrb[44].mxu0 %v2063_v24 }
  0xd3   : > { %831 = vmatprep.mubr.bf16.mxu0 %v2064_v25 }
  0xda   : > { %832 = vmatmul.mubr.bf16.gmra.mrb[48].mxu0 %v2066_v26 }
  0xdb   : > { %839 = vmatprep.mubr.bf16.mxu0 %v2067_v27 }
  0xe2   : > { %840 = vmatmul.mubr.bf16.gmra.mrb[52].mxu0 %v2069_v28 }
  0xe3   : > { %847 = vmatprep.mubr.bf16.mxu0 %v2070_v29 }
  0xea   : > { %848 = vmatmul.mubr.bf16.gmra.mrb[56].mxu0 %v2072_v30 }
  0xeb   : > { %855 = vmatprep.mubr.bf16.mxu0 %v2073_v31 }
  0xf2   : > { %856 = vmatmul.mubr.bf16.gmra.mrb[60].mxu0 %v2075_v32 }
  0xf3   : > { %863 = vmatprep.mubr.bf16.mxu0 %v2076_v33  ;;  %v2129_v33 = vld [vmem:[%s2485_s11 + $0x8] sm:$0xff]  }
  0xfa   : > { %864 = vmatmul.mubr.bf16.gmra.mrb[64].mxu0 %v2078_v34 }
  0xfb   : > { %871 = vmatprep.mubr.bf16.mxu0 %v2079_v35 }
 0x102   : > { %872 = vmatmul.mubr.bf16.gmra.mrb[68].mxu0 %v2081_v36 }
 0x103   : > { %879 = vmatprep.mubr.bf16.mxu0 %v2082_v37 }
 0x10a   : > { %880 = vmatmul.mubr.bf16.gmra.mrb[72].mxu0 %v2084_v38 }
 0x10b   : > { %887 = vmatprep.mubr.bf16.mxu0 %v2085_v39 }
 0x112   : > { %888 = vmatmul.mubr.bf16.gmra.mrb[76].mxu0 %v2087_v40 }
 0x113   : > { %895 = vmatprep.mubr.bf16.mxu0 %v2091_v41 }
 0x11a   : > { %896 = vmatmul.mubr.bf16.gmra.mrb[80].mxu0 %v2093_v42 }
 0x11b   : > { %903 = vmatprep.mubr.bf16.mxu0 %v2097_v43 }
 0x122   : > { %904 = vmatmul.mubr.bf16.gmra.mrb[84].mxu0 %v2099_v44 }
 0x123   : > { %911 = vmatprep.mubr.bf16.mxu0 %v2103_v45 }
 0x12a   : > { %912 = vmatmul.mubr.bf16.gmra.mrb[88].mxu0 %v2105_v46 }
 0x12b   : > { %919 = vmatprep.mubr.bf16.mxu0 %v2109_v47 }
 0x132   : > { %920 = vmatmul.mubr.bf16.gmra.mrb[92].mxu0 %v2111_v48 }
 0x14d   : > { %v2489_v51 = vpop.f32.mrb[0].mxu0  ;;  %v2515_v9 = vpop.f32.mrb[0].mxu1 }
 0x14e   : > { %v739_v52 = vpop.f32.mrb[1].mxu0  ;;  %v931_v10 = vpop.f32.mrb[1].mxu1 }
 0x14f   : > { %v2491_v53 = vpop.f32.mrb[2].mxu0  ;;  %v2517_v11 = vpop.f32.mrb[2].mxu1 }
 0x150   : > { %v742_v55 = vpop.f32.mrb[3].mxu0  ;;  %v934_v13 = vpop.f32.mrb[3].mxu1 }
 0x155   : > { %v2497_v58 = vpop.f32.mrb[4].mxu0  ;;  %v2530_v20 = vpop.f32.mrb[4].mxu1 }
 0x156   : > { %v747_v59 = vpop.f32.mrb[5].mxu0  ;;  %v939_v21 = vpop.f32.mrb[5].mxu1 }
 0x157   : > { %v2499_v60 = vpop.f32.mrb[6].mxu0  ;;  %v2533_v22 = vpop.f32.mrb[6].mxu1 }
 0x158   : > { %v750_v62 = vpop.f32.mrb[7].mxu0  ;;  %v942_v24 = vpop.f32.mrb[7].mxu1 }
 0x15d   : > { %v2503_v63 = vpop.f32.mrb[8].mxu0  ;;  %v2543_v30 = vpop.f32.mrb[8].mxu1 }
 0x15e   : > { %v755_v0 = vpop.f32.mrb[9].mxu0  ;;  %v947_v31 = vpop.f32.mrb[9].mxu1 }
 0x15f   : > { %v2505_v1 = vpop.f32.mrb[10].mxu0  ;;  %v2545_v32 = vpop.f32.mrb[10].mxu1 }
 0x160   : > { %v758_v3 = vpop.f32.mrb[11].mxu0  ;;  %v950_v34 = vpop.f32.mrb[11].mxu1 }
 0x165   : > { %v2509_v4 = vpop.f32.mrb[12].mxu0  ;;  %v2555_v40 = vpop.f32.mrb[12].mxu1 }
 0x166   : > { %v763_v5 = vpop.f32.mrb[13].mxu0  ;;  %v955_v41 = vpop.f32.mrb[13].mxu1 }
 0x167   : > { %v2511_v6 = vpop.f32.mrb[14].mxu0  ;;  %v2557_v42 = vpop.f32.mrb[14].mxu1 }
 0x168   : > { %v766_v8 = vpop.f32.mrb[15].mxu0  ;;  %v958_v44 = vpop.f32.mrb[15].mxu1 }
 0x16d   : > { %v2521_v14 = vpop.f32.mrb[16].mxu0  ;;  %v2567_v50 = vpop.f32.mrb[16].mxu1 }
 0x16e   : > { %v771_v15 = vpop.f32.mrb[17].mxu0  ;;  %v963_v52 = vpop.f32.mrb[17].mxu1 }
 0x16f   : > { %v2523_v16 = vpop.f32.mrb[18].mxu0  ;;  %v2569_v55 = vpop.f32.mrb[18].mxu1 }
 0x170   : > { %v774_v18 = vpop.f32.mrb[19].mxu0  ;;  %v966_v57 = vpop.f32.mrb[19].mxu1 }
 0x175   : > { %v2537_v25 = vpop.f32.mrb[20].mxu0  ;;  %v2579_v8 = vpop.f32.mrb[20].mxu1 }
 0x176   : > { %v779_v26 = vpop.f32.mrb[21].mxu0  ;;  %v971_v10 = vpop.f32.mrb[21].mxu1 }
 0x177   : > { %v2539_v27 = vpop.f32.mrb[22].mxu0  ;;  %v2581_v13 = vpop.f32.mrb[22].mxu1 }
 0x178   : > { %v782_v29 = vpop.f32.mrb[23].mxu0  ;;  %v974_v18 = vpop.f32.mrb[23].mxu1 }
 0x17d   : > { %v2549_v35 = vpop.f32.mrb[24].mxu0  ;;  %v2591_v34 = vpop.f32.mrb[24].mxu1 }
 0x17e   : > { %v787_v36 = vpop.f32.mrb[25].mxu0 }
 0x17f   : > { %v2551_v37 = vpop.f32.mrb[26].mxu0  ;;  %v979_v36 = vpop.f32.mrb[25].mxu1 }
 0x180   : > { %v790_v39 = vpop.f32.mrb[27].mxu0 }
 0x181   : > { %v2593_v39 = vpop.f32.mrb[26].mxu1 }
 0x182   : > { %v982_v44 = vpop.f32.mrb[27].mxu1 }
 0x185   : > { %v2561_v45 = vpop.f32.mrb[28].mxu0 }
 0x186   : > { %v795_v46 = vpop.f32.mrb[29].mxu0 }
 0x187   : > { %v2563_v47 = vpop.f32.mrb[30].mxu0 }
 0x188   : > { %v798_v49 = vpop.f32.mrb[31].mxu0 }
 0x18d   : > { %v2573_v59 = vpop.f32.mrb[32].mxu0 }
 0x18e   : > { %v803_v62 = vpop.f32.mrb[33].mxu0 }
 0x18f   : > { %v2575_v0 = vpop.f32.mrb[34].mxu0 }
 0x190   : > { %v806_v5 = vpop.f32.mrb[35].mxu0 }
 0x191   : > { %v2603_v5 = vpop.f32.mrb[28].mxu1 }
 0x192   : > { %v987_v10 = vpop.f32.mrb[29].mxu1 }
 0x193   : > { %v2605_v18 = vpop.f32.mrb[30].mxu1 }
 0x194   : > { %v990_v36 = vpop.f32.mrb[31].mxu1 }
 0x195   : > { %v2585_v21 = vpop.f32.mrb[36].mxu0 }
 0x196   : > { %v811_v24 = vpop.f32.mrb[37].mxu0 }
 0x197   : > { %v2587_v26 = vpop.f32.mrb[38].mxu0 }
 0x198   : > { %v814_v31 = vpop.f32.mrb[39].mxu0 }
 0x19d   : > { %v2597_v46 = vpop.f32.mrb[40].mxu0 }
 0x19e   : > { %v819_v49 = vpop.f32.mrb[41].mxu0 }
 0x19f   : > { %v2599_v52 = vpop.f32.mrb[42].mxu0 }
 0x1a0   : > { %v822_v62 = vpop.f32.mrb[43].mxu0 }
 0x1a5   : > { %v2607_v24 = vpop.f32.mrb[44].mxu0 }
 0x1a6   : > { %v827_v44 = vpop.f32.mrb[45].mxu0 }
 0x1a7   : > { %v2611_v29 = vpop.f32.mrb[46].mxu0 }
 0x1a8   : > { %v830_v3 = vpop.f32.mrb[47].mxu0 }
 0x1ad   : > { %v2615_v57 = vpop.f32.mrb[48].mxu0 }
 0x1ae   : > { %v835_v62 = vpop.f32.mrb[49].mxu0 }
 0x1af   : > { %v2617_v48 = vpop.f32.mrb[50].mxu0 }
 0x1b0   : > { %v838_v38 = vpop.f32.mrb[51].mxu0 }
 0x1b5   : > { %v2621_v28 = vpop.f32.mrb[52].mxu0 }
 0x1b6   : > { %v843_v17 = vpop.f32.mrb[53].mxu0 }
 0x1b7   : > { %v2623_v36 = vpop.f32.mrb[54].mxu0 }
 0x1b8   : > { %v846_v7 = vpop.f32.mrb[55].mxu0 }
 0x1bd   : > { %v2627_v49 = vpop.f32.mrb[56].mxu0 }
 0x1be   : > { %v851_v3 = vpop.f32.mrb[57].mxu0 }
 0x1bf   : > { %v2629_v2 = vpop.f32.mrb[58].mxu0 }
 0x1c0   : > { %v854_v61 = vpop.f32.mrb[59].mxu0 }
 0x1c5   : > { %v2633_v10 = vpop.f32.mrb[60].mxu0 }
 0x1c6   : > { %v859_v38 = vpop.f32.mrb[61].mxu0 }
 0x1c7   : > { %v2635_v17 = vpop.f32.mrb[62].mxu0 }
 0x1c8   : > { %v862_v44 = vpop.f32.mrb[63].mxu0 }
 0x1c9   : > { %v2130_v44 = vld [vmem:[%s2485_s11 + $0x10] sm:$0xff]  }
 0x1cd   : > { %v865_v7 = vpop.f32.mrb[64].mxu0 }
 0x1ce   : > { %v867_v31 = vpop.f32.mrb[65].mxu0 }
 0x1cf   : > { %v868_v3 = vpop.f32.mrb[66].mxu0 }
 0x1d0   : > { %v1008_v41 = vpack.c.bf16 %v868_v3, %v865_v7  ;;  %v870_v15 = vpop.f32.mrb[67].mxu0 }
 0x1d2   : > { %1834 = vmatprep.mubr.msk.bf16.mxu1 %vm1064_vm0, %v1008_v41  ;;  %v2131_v41 = vld [vmem:[%s2485_s11 + $0x18] sm:$0xff]  }
 0x1d5   : > { %v873_v61 = vpop.f32.mrb[68].mxu0 }
 0x1d6   : > { %v875_v62 = vpop.f32.mrb[69].mxu0 }
 0x1d7   : > { %v876_v38 = vpop.f32.mrb[70].mxu0 }
 0x1d8   : > { %v1009_v56 = vpack.c.bf16 %v876_v38, %v873_v61  ;;  %v878_v43 = vpop.f32.mrb[71].mxu0 }
 0x1da   : > { %1835 = vmatmul.mubr.msk.bf16.vlgmr.msra.gmra.mrb[32].mxu1 %vm1064_vm0, %v1009_v56 }
 0x1db   : > { %1867 = vmatpush3.bf16.msra.mxu1 %v2528_v19 }
 0x1dc   : > { %1868 = vmatprep.subr.bf16.mxu1 %v2129_v33 }
 0x1dd   : > { %v881_v31 = vpop.f32.mrb[72].mxu0 }
 0x1de   : > { %v883_v54 = vpop.f32.mrb[73].mxu0 }
 0x1df   : > { %v884_v23 = vpop.f32.mrb[74].mxu0  ;;  %1869 = vmatpush3.bf16.msra.mxu1 %v2129_v33 }
 0x1e0   : > { %v1010_v15 = vpack.c.bf16 %v884_v23, %v881_v31  ;;  %v886_v7 = vpop.f32.mrb[75].mxu0  ;;  %1870 = vmatprep.subr.bf16.mxu1 %v2130_v44 }
 0x1e2   : > { %1838 = vmatprep.mubr.msk.bf16.mxu1 %vm1064_vm0, %v1010_v15 }
 0x1e3   : > { %1871 = vmatpush3.bf16.msra.mxu1 %v2130_v44 }
 0x1e4   : > { %1872 = vmatprep.subr.bf16.mxu1 %v2131_v41 }
 0x1e5   : > { %v889_v43 = vpop.f32.mrb[76].mxu0 }
 0x1e6   : > { %v891_v62 = vpop.f32.mrb[77].mxu0 }
 0x1e7   : > { %v892_v3 = vpop.f32.mrb[78].mxu0  ;;  %1873 = vmatpush3.bf16.msra.mxu1 %v2131_v41 }
 0x1e8   : > { %v1011_v56 = vpack.c.bf16 %v892_v3, %v889_v43  ;;  %v894_v19 = vpop.f32.mrb[79].mxu0 }
 0x1ea   : > { %1839 = vmatmul.mubr.msk.bf16.gmra.mrb[36].mxu1 %vm1064_vm0, %v1011_v56 }
 0x1ed   : > { %v897_v61 = vpop.f32.mrb[80].mxu0 }
 0x1ee   : > { %v899_v54 = vpop.f32.mrb[81].mxu0 }
 0x1ef   : > { %v900_v38 = vpop.f32.mrb[82].mxu0 }
 0x1f0   : > { %v1012_v33 = vpack.c.bf16 %v900_v38, %v897_v61  ;;  %v902_v23 = vpop.f32.mrb[83].mxu0 }
 0x1f2   : > { %1842 = vmatprep.mubr.msk.bf16.mxu1 %vm1064_vm0, %v1012_v33  ;;  %v2843_v33 = vpack.c.bf16 %v2517_v11, %v2515_v9  ;;  %v2847_v9 = vpack.c.bf16 %v2569_v55, %v2567_v50  ;;  %v2848_v11 = vpack.c.bf16 %v2581_v13, %v2579_v8 }
 0x1f5   : > { %v905_v31 = vpop.f32.mrb[84].mxu0 }
 0x1f6   : > { %v907_v7 = vpop.f32.mrb[85].mxu0 }
 0x1f7   : > { %v908_v15 = vpop.f32.mrb[86].mxu0  ;;  %v2846_v7 = vpack.c.bf16 %v2557_v42, %v2555_v40  ;;  %v2853_v40 = vpack.c.bf16 %v2505_v1, %v2503_v63  ;;  %v2854_v42 = vpack.c.bf16 %v2511_v6, %v2509_v4  ;;  %v2859_v63 = vpack.c.bf16 %v2575_v0, %v2573_v59 }
 0x1f8   : > { %v1013_v44 = vpack.c.bf16 %v908_v15, %v905_v31  ;;  %v910_v12 = vpop.f32.mrb[87].mxu0  ;;  %v2845_v31 = vpack.c.bf16 %v2545_v32, %v2543_v30  ;;  %v2851_v30 = vpack.c.bf16 %v2491_v53, %v2489_v51  ;;  %v2852_v32 = vpack.c.bf16 %v2499_v60, %v2497_v58 }
 0x1f9   : > { %v2844_v12 = vpack.c.bf16 %v2533_v22, %v2530_v20  ;;  %v2849_v20 = vpack.c.bf16 %v2593_v39, %v2591_v34  ;;  %v2850_v22 = vpack.c.bf16 %v2605_v18, %v2603_v5  ;;  %v2855_v51 = vpack.c.bf16 %v2523_v16, %v2521_v14 }
 0x1fa   : > { %1843 = vmatmul.mubr.msk.bf16.gmra.mrb[40].mxu1 %vm1064_vm0, %v1013_v44  ;;  %v2856_v53 = vpack.c.bf16 %v2539_v27, %v2537_v25  ;;  %v2857_v58 = vpack.c.bf16 %v2551_v37, %v2549_v35  ;;  %v2858_v60 = vpack.c.bf16 %v2563_v47, %v2561_v45  ;;  %v2860_v1 = vpack.c.bf16 %v2587_v26, %v2585_v21 }
 0x1fb   : > { %v2861_v4 = vpack.c.bf16 %v2599_v52, %v2597_v46  ;;  %v2862_v6 = vpack.c.bf16 %v2611_v29, %v2607_v24  ;;  %v2863_v14 = vpack.c.bf16 %v2617_v48, %v2615_v57  ;;  %v2864_v16 = vpack.c.bf16 %v2623_v36, %v2621_v28 }
 0x1fc   : > { %v2865_v25 = vpack.c.bf16 %v2629_v2, %v2627_v49  ;;  %v2866_v27 = vpack.c.bf16 %v2635_v17, %v2633_v10 }
 0x1fd   : > { %v913_v62 = vpop.f32.mrb[88].mxu0 }
 0x1fe   : > { %v915_v41 = vpop.f32.mrb[89].mxu0 }
 0x1ff   : > { %v916_v43 = vpop.f32.mrb[90].mxu0 }
 0x200   : > { %v1014_v3 = vpack.c.bf16 %v916_v43, %v913_v62  ;;  %v918_v19 = vpop.f32.mrb[91].mxu0 }
 0x202   : > { %1846 = vmatprep.mubr.msk.bf16.mxu1 %vm1064_vm0, %v1014_v3 }
 0x205   : > { %v921_v56 = vpop.f32.mrb[92].mxu0 }
 0x206   : > { %v923_v54 = vpop.f32.mrb[93].mxu0 }
 0x207   : > { %v924_v61 = vpop.f32.mrb[94].mxu0 }
 0x208   : > { %v1015_v38 = vpack.c.bf16 %v924_v61, %v921_v56  ;;  %v926_v23 = vpop.f32.mrb[95].mxu0 }
 0x20a   : > { %1847 = vmatmul.mubr.msk.bf16.gmra.mrb[44].mxu1 %vm1064_vm0, %v1015_v38 }
 0x20b   : > { %1850 = vmatprep.mubr.msk.bf16.mxu1 %vm1064_vm0, %v2843_v33 }
 0x212   : > { %1851 = vmatmul.mubr.msk.bf16.gmra.mrb[48].mxu1 %vm1064_vm0, %v2844_v12 }
 0x213   : > { %1854 = vmatprep.mubr.msk.bf16.mxu1 %vm1064_vm0, %v2845_v31 }
 0x21a   : > { %1855 = vmatmul.mubr.msk.bf16.gmra.mrb[52].mxu1 %vm1064_vm0, %v2846_v7 }
 0x21b   : > { %1858 = vmatprep.mubr.msk.bf16.mxu1 %vm1064_vm0, %v2847_v9 }
 0x222   : > { %1859 = vmatmul.mubr.msk.bf16.gmra.mrb[56].mxu1 %vm1064_vm0, %v2848_v11 }
 0x223   : > { %1862 = vmatprep.mubr.msk.bf16.mxu1 %vm1064_vm0, %v2849_v20 }
 0x22a   : > { %1863 = vmatmul.mubr.msk.bf16.gmra.mrb[60].mxu1 %vm1064_vm0, %v2850_v22 }
 0x22b   : > { %1874 = vmatprep.mubr.msk.bf16.mxu1 %vm1064_vm0, %v2851_v30 }
 0x232   : > { %1875 = vmatmul.mubr.msk.bf16.vlgmr.msra.gmra.mrb[32].mxu1 %vm1064_vm0, %v2852_v32 }
 0x233   : > { %1878 = vmatprep.mubr.msk.bf16.mxu1 %vm1064_vm0, %v2853_v40 }
 0x23a   : > { %1879 = vmatmul.mubr.msk.bf16.gmra.mrb[36].mxu1 %vm1064_vm0, %v2854_v42 }
 0x23b   : > { %1882 = vmatprep.mubr.msk.bf16.mxu1 %vm1064_vm0, %v2855_v51 }
 0x242   : > { %1883 = vmatmul.mubr.msk.bf16.gmra.mrb[40].mxu1 %vm1064_vm0, %v2856_v53 }
 0x243   : > { %1886 = vmatprep.mubr.msk.bf16.mxu1 %vm1064_vm0, %v2857_v58 }
 0x24a   : > { %1887 = vmatmul.mubr.msk.bf16.gmra.mrb[44].mxu1 %vm1064_vm0, %v2858_v60 }
 0x24b   : > { %1890 = vmatprep.mubr.msk.bf16.mxu1 %vm1064_vm0, %v2859_v63 }
 0x252   : > { %1891 = vmatmul.mubr.msk.bf16.gmra.mrb[48].mxu1 %vm1064_vm0, %v2860_v1 }
 0x253   : > { %1894 = vmatprep.mubr.msk.bf16.mxu1 %vm1064_vm0, %v2861_v4 }
 0x25a   : > { %1895 = vmatmul.mubr.msk.bf16.gmra.mrb[52].mxu1 %vm1064_vm0, %v2862_v6 }
 0x25b   : > { %1898 = vmatprep.mubr.msk.bf16.mxu1 %vm1064_vm0, %v2863_v14 }
 0x262   : > { %1899 = vmatmul.mubr.msk.bf16.gmra.mrb[56].mxu1 %vm1064_vm0, %v2864_v16 }
 0x263   : > { %1902 = vmatprep.mubr.msk.bf16.mxu1 %vm1064_vm0, %v2865_v25 }
 0x26a   : > { %1903 = vmatmul.mubr.msk.bf16.gmra.mrb[60].mxu1 %vm1064_vm0, %v2866_v27 }
 0x305   : > { %v1876_v2 = vpop.f32.mrb[32].mxu1 }
 0x306   : > { %1509 = vst.msk [vmem:[%s2752_s20 + $0x10] sm:$0xff] %vm1064_vm0, %v1876_v2  ;;  %v1380_v28 = vpop.f32.mrb[33].mxu1 }
 0x307   : > { %1507 = vst.msk [vmem:[%s2752_s20] sm:$0xff] %vm1064_vm0, %v1380_v28  ;;  %v1877_v35 = vpop.f32.mrb[34].mxu1 }
 0x308   : > { %1510 = vst.msk [vmem:[%s2752_s20 + $0x18] sm:$0xff] %vm1064_vm0, %v1877_v35  ;;  %v1383_v37 = vpop.f32.mrb[35].mxu1 }
 0x309   : > { %1508 = vst.msk [vmem:[%s2752_s20 + $0x8] sm:$0xff] %vm1064_vm0, %v1383_v37 }
 0x30d   : > { %v1880_v45 = vpop.f32.mrb[36].mxu1 }
 0x30e   : > { %1513 = vst.msk [vmem:[%s2752_s20 + $0x30] sm:$0xff] %vm1064_vm0, %v1880_v45  ;;  %v1396_v47 = vpop.f32.mrb[37].mxu1 }
 0x30f   : > { %1511 = vst.msk [vmem:[%s2752_s20 + $0x20] sm:$0xff] %vm1064_vm0, %v1396_v47  ;;  %v1881_v48 = vpop.f32.mrb[38].mxu1 }
 0x310   : > { %1514 = vst.msk [vmem:[%s2752_s20 + $0x38] sm:$0xff] %vm1064_vm0, %v1881_v48  ;;  %v1399_v50 = vpop.f32.mrb[39].mxu1 }
 0x311   : > { %1512 = vst.msk [vmem:[%s2752_s20 + $0x28] sm:$0xff] %vm1064_vm0, %v1399_v50 }
 0x315   : > { %v1884_v55 = vpop.f32.mrb[40].mxu1 }
 0x316   : > { %1517 = vst.msk [vmem:[%s2752_s20 + $0x50] sm:$0xff] %vm1064_vm0, %v1884_v55  ;;  %v1412_v59 = vpop.f32.mrb[41].mxu1 }
 0x317   : > { %1515 = vst.msk [vmem:[%s2752_s20 + $0x40] sm:$0xff] %vm1064_vm0, %v1412_v59  ;;  %v1885_v0 = vpop.f32.mrb[42].mxu1 }
 0x318   : > { %1518 = vst.msk [vmem:[%s2752_s20 + $0x58] sm:$0xff] %vm1064_vm0, %v1885_v0  ;;  %v1415_v8 = vpop.f32.mrb[43].mxu1 }
 0x319   : > { %1516 = vst.msk [vmem:[%s2752_s20 + $0x48] sm:$0xff] %vm1064_vm0, %v1415_v8 }
 0x31d   : > { %v1888_v13 = vpop.f32.mrb[44].mxu1 }
 0x31e   : > { %1521 = vst.msk [vmem:[%s2752_s20 + $0x70] sm:$0xff] %vm1064_vm0, %v1888_v13  ;;  %v1428_v21 = vpop.f32.mrb[45].mxu1 }
 0x31f   : > { %1519 = vst.msk [vmem:[%s2752_s20 + $0x60] sm:$0xff] %vm1064_vm0, %v1428_v21  ;;  %v1889_v26 = vpop.f32.mrb[46].mxu1 }
 0x320   : > { %1522 = vst.msk [vmem:[%s2752_s20 + $0x78] sm:$0xff] %vm1064_vm0, %v1889_v26  ;;  %v1431_v29 = vpop.f32.mrb[47].mxu1 }
 0x321   : > { %1520 = vst.msk [vmem:[%s2752_s20 + $0x68] sm:$0xff] %vm1064_vm0, %v1431_v29 }
 0x325   : > { %v1892_v34 = vpop.f32.mrb[48].mxu1 }
 0x326   : > { %1525 = vst.msk [vmem:[%s2752_s20 + $0x90] sm:$0xff] %vm1064_vm0, %v1892_v34  ;;  %v1444_v39 = vpop.f32.mrb[49].mxu1 }
 0x327   : > { %1523 = vst.msk [vmem:[%s2752_s20 + $0x80] sm:$0xff] %vm1064_vm0, %v1444_v39  ;;  %v1893_v46 = vpop.f32.mrb[50].mxu1 }
 0x328   : > { %1526 = vst.msk [vmem:[%s2752_s20 + $0x98] sm:$0xff] %vm1064_vm0, %v1893_v46  ;;  %v1447_v52 = vpop.f32.mrb[51].mxu1 }
 0x329   : > { %1524 = vst.msk [vmem:[%s2752_s20 + $0x88] sm:$0xff] %vm1064_vm0, %v1447_v52 }
 0x32d   : > { %v1896_v57 = vpop.f32.mrb[52].mxu1 }
 0x32e   : > { %1529 = vst.msk [vmem:[%s2752_s20 + $0xb0] sm:$0xff] %vm1064_vm0, %v1896_v57  ;;  %v1460_v5 = vpop.f32.mrb[53].mxu1 }
 0x32f   : > { %1527 = vst.msk [vmem:[%s2752_s20 + $0xa0] sm:$0xff] %vm1064_vm0, %v1460_v5  ;;  %v1897_v18 = vpop.f32.mrb[54].mxu1 }
 0x330   : > { %1530 = vst.msk [vmem:[%s2752_s20 + $0xb8] sm:$0xff] %vm1064_vm0, %v1897_v18  ;;  %v1463_v24 = vpop.f32.mrb[55].mxu1 }
 0x331   : > { %1528 = vst.msk [vmem:[%s2752_s20 + $0xa8] sm:$0xff] %vm1064_vm0, %v1463_v24 }
 0x335   : > { %v1900_v49 = vpop.f32.mrb[56].mxu1 }
 0x336   : > { %1533 = vst.msk [vmem:[%s2752_s20 + $0xd0] sm:$0xff] %vm1064_vm0, %v1900_v49  ;;  %v1476_v10 = vpop.f32.mrb[57].mxu1 }
 0x337   : > { %1531 = vst.msk [vmem:[%s2752_s20 + $0xc0] sm:$0xff] %vm1064_vm0, %v1476_v10  ;;  %v1901_v36 = vpop.f32.mrb[58].mxu1 }
 0x338   : > { %1534 = vst.msk [vmem:[%s2752_s20 + $0xd8] sm:$0xff] %vm1064_vm0, %v1901_v36  ;;  %v1479_v17 = vpop.f32.mrb[59].mxu1 }
 0x339   : > { %1532 = vst.msk [vmem:[%s2752_s20 + $0xc8] sm:$0xff] %vm1064_vm0, %v1479_v17 }
 0x33d   : > { %v1904_v15 = vpop.f32.mrb[60].mxu1 }
 0x33e   : > { %1537 = vst.msk [vmem:[%s2752_s20 + $0xf0] sm:$0xff] %vm1064_vm0, %v1904_v15  ;;  %v1492_v44 = vpop.f32.mrb[61].mxu1 }
 0x33f   : > { %1535 = vst.msk [vmem:[%s2752_s20 + $0xe0] sm:$0xff] %vm1064_vm0, %v1492_v44  ;;  %v1905_v62 = vpop.f32.mrb[62].mxu1 }
 0x340   : > { %1538 = vst.msk [vmem:[%s2752_s20 + $0xf8] sm:$0xff] %vm1064_vm0, %v1905_v62  ;;  %v1495_v41 = vpop.f32.mrb[63].mxu1 }
 0x341   : > { %1536 = vst.msk [vmem:[%s2752_s20 + $0xe8] sm:$0xff] %vm1064_vm0, %v1495_v41 }
 0x342 PF: > { %s16_s17 = sadd.s32 1, %s2212_s17   ;;  %s2867_s12 = smov %s2196_s13 }
 0x343   : > { %p13_p7 = scmp.ge.s32.totalorder %s16_s17, 4   ;;  %s2868_s13 = smov %s2200_s14 }
 0x344   : > { %s2869_s14 = smov %s2287_s24  ;;  %s2870_s15 = smov %s2208_s16 }
 0x345   : > { %s2871_s16 = smov %s2873_s19  ;;  %15 = sbr.rel (!%p13_p7) target bundleno = 4 (0x4), region = 78 }
 0x34c   :  { %1569 = vsyncpa [#allocation3], 1 }
 0x34d   :  { %1571 = vsyncpa [#allocation3 + $0x1], 1 }

</bundles_post_ra>
